<compile_context>
chip_gen: v5e
topology: v5e:2x2
jax: 0.10.0
libtpu: 0.0.40
codegen_flags: <defaults>
</compile_context>

<pallas_src>
import jax
import jax.numpy as jnp
from jax.experimental import pallas as pl
from jax.experimental.pallas import tpu as pltpu


def _round_up(n, m):
    return ((n + m - 1) // m) * m


def mlp_kernel(xT_ref, w1_ref, b1_ref, w2_ref, b2_ref, w3_ref, b3_ref, o_ref):
    # Feature-major: batch on the lane axis, features on the sublane axis.
    # fc1: (16, 8) @ (8, TB) + (16, 1) -> relu
    h1 = jnp.dot(w1_ref[...], xT_ref[...], preferred_element_type=jnp.float32)
    h1 = jnp.maximum(h1 + b1_ref[...], 0.0)
    # fc2: (32, 16) @ (16, TB) + (32, 1) -> relu
    h2 = jnp.dot(w2_ref[...], h1, preferred_element_type=jnp.float32)
    h2 = jnp.maximum(h2 + b2_ref[...], 0.0)
    # fc3: 32 -> 1 projection as broadcast-mul + sublane reduce (VPU + XLU)
    # instead of an M=1 MXU matmul.  b3 is an SMEM scalar.
    y = jnp.sum(h2 * w3_ref[...], axis=0, keepdims=True) + b3_ref[0, 0]
    o_ref[...] = y.astype(o_ref.dtype)


def net_forward(x, params, tb=8192):
    """x: (B, 8) float32. params: PyTorch-style Linear params (see init_params)."""
    w1, b1, w2, b2, w3, b3 = params
    B = x.shape[0]

    # Minimal layout padding only: batch (lane axis) padded to a multiple of
    # 128.  We do NOT pad up to a multiple of TB -- the last grid block is
    # ragged instead (masked store), avoiding an extra HBM pass over x.
    Bp = _round_up(B, 128)
    xT = x.T                                   # (8, B): one-time tiny relayout
    if Bp != B:
        xT = jnp.pad(xT, ((0, 0), (0, Bp - B)))

    # Batch tile: large enough to amortize per-step overhead, capped so that
    # the grid has >= 2 steps (feeds both v7x TensorCores) when possible.
    TB = min(tb, Bp)
    if Bp > 256:
        TB = min(TB, _round_up(-(-Bp // 2), 128))
    grid = (pl.cdiv(Bp, TB),)

    # One-time reshapes: biases / w3 as (features, 1) columns, b3 as a scalar.
    b1c = b1.reshape(16, 1)
    b2c = b2.reshape(32, 1)
    w3c = w3.reshape(32, 1)
    b3s = b3.reshape(1, 1)

    out = pl.pallas_call(
        mlp_kernel,
        out_shape=jax.ShapeDtypeStruct((1, Bp), jnp.float32),
        grid=grid,
        in_specs=[
            pl.BlockSpec((8, TB), lambda i: (0, i)),      # x^T: batch-tiled, lane-dense
            pl.BlockSpec((16, 8), lambda i: (0, 0)),      # w1: VMEM-resident
            pl.BlockSpec((16, 1), lambda i: (0, 0)),      # b1
            pl.BlockSpec((32, 16), lambda i: (0, 0)),     # w2
            pl.BlockSpec((32, 1), lambda i: (0, 0)),      # b2
            pl.BlockSpec((32, 1), lambda i: (0, 0)),      # w3 column
            pl.BlockSpec(memory_space=pltpu.MemorySpace.SMEM),  # b3 scalar
        ],
        out_specs=pl.BlockSpec((1, TB), lambda i: (0, i)),       # lane-dense output
        compiler_params=pltpu.CompilerParams(
            dimension_semantics=("parallel",),   # v7x: shard batch grid across both TCs
            vmem_limit_bytes=32 * 1024 * 1024,   # explicit; safe on v5e/v6e/v7x
        ),
    )(xT, w1, b1c, w2, b2c, w3c, b3s)
    return out[:, :B].T                          # back to (B, 1)


def init_params(key):
    """Deterministic init mimicking nn.Linear (uniform in +-1/sqrt(fan_in))."""
    def linear(k, out_f, in_f):
        kw, kb = jax.random.split(k)
        bound = 1.0 / jnp.sqrt(jnp.float32(in_f))
        w = jax.random.uniform(kw, (out_f, in_f), jnp.float32, -bound, bound)
        b = jax.random.uniform(kb, (out_f,), jnp.float32, -bound, bound)
        return w, b

    k1, k2, k3 = jax.random.split(key, 3)
    w1, b1 = linear(k1, 16, 8)
    w2, b2 = linear(k2, 32, 16)
    w3, b3 = linear(k3, 1, 32)
    return (w1, b1, w2, b2, w3, b3)


def _reference(x, params):
    w1, b1, w2, b2, w3, b3 = params
    h = jnp.maximum(x @ w1.T + b1, 0.0)
    h = jnp.maximum(h @ w2.T + b2, 0.0)
    return h @ w3.T + b3


if __name__ == "__main__":
    key = jax.random.PRNGKey(0)
    kx, kp, kx2 = jax.random.split(key, 3)
    params = init_params(kp)

    # Small demo batch (padded to one 128-wide lane block, grid=(1,)).
    B = 8
    x = jax.random.normal(kx, (B, 8), jnp.float32)
    out = net_forward(x, params)
    jax.block_until_ready(out)
    assert out.shape == (B, 1)
    assert jnp.allclose(out, _reference(x, params), atol=1e-5, rtol=1e-5)

    # Larger batch exercising the multi-step batch grid (Bp=1024, TB=512, grid=(2,)).
    B2 = 1000
    x2 = jax.random.normal(kx2, (B2, 8), jnp.float32)
    out2 = net_forward(x2, params)
    jax.block_until_ready(out2)
    assert out2.shape == (B2, 1)
    assert jnp.allclose(out2, _reference(x2, params), atol=1e-5, rtol=1e-5)

    print("KERNEL_OK")
</pallas_src>

<mosaic_0001>
module attributes {stable_mosaic.version = 11 : i64} {
  func.func @mlp_kernel(%arg0: i32, %arg1: memref<8x128xf32, #tpu.memory_space<vmem>>, %arg2: memref<16x8xf32, #tpu.memory_space<vmem>>, %arg3: memref<16x1xf32, #tpu.memory_space<vmem>>, %arg4: memref<32x16xf32, #tpu.memory_space<vmem>>, %arg5: memref<32x1xf32, #tpu.memory_space<vmem>>, %arg6: memref<32x1xf32, #tpu.memory_space<vmem>>, %arg7: memref<1x1xf32, #tpu.memory_space<smem>>, %arg8: memref<1x128xf32, #tpu.memory_space<vmem>>) attributes {dimension_semantics = [#tpu.dimension_semantics<parallel>], iteration_bounds = array<i64: 1>, scalar_prefetch = 0 : i64, scratch_operands = 0 : i64, tpu.core_type = #tpu.core_type<tc>, window_params = [{transform_indices = @transform_0, window_bounds = array<i64: 8, 128>}, {pipeline_mode = #tpu.pipeline_mode<synchronous>, transform_indices = @transform_1, window_bounds = array<i64: 16, 8>}, {pipeline_mode = #tpu.pipeline_mode<synchronous>, transform_indices = @transform_2, window_bounds = array<i64: 16, 1>}, {pipeline_mode = #tpu.pipeline_mode<synchronous>, transform_indices = @transform_3, window_bounds = array<i64: 32, 16>}, {pipeline_mode = #tpu.pipeline_mode<synchronous>, transform_indices = @transform_4, window_bounds = array<i64: 32, 1>}, {pipeline_mode = #tpu.pipeline_mode<synchronous>, transform_indices = @transform_5, window_bounds = array<i64: 32, 1>}, {transform_indices = @transform_6, window_bounds = array<i64: 1, 1>}, {transform_indices = @transform_7, window_bounds = array<i64: 1, 128>}]} {
    %c0 = arith.constant 0 : index
    %c0_0 = arith.constant 0 : index
    %0 = vector.load %arg2[%c0, %c0_0] : memref<16x8xf32, #tpu.memory_space<vmem>>, vector<16x8xf32>
    %c0_1 = arith.constant 0 : index
    %c0_2 = arith.constant 0 : index
    %1 = vector.load %arg1[%c0_1, %c0_2] : memref<8x128xf32, #tpu.memory_space<vmem>>, vector<8x128xf32>
    %cst = arith.constant dense<0.000000e+00> : vector<16x128xf32>
    %2 = tpu.matmul %0, %1, %cst {dimension_numbers = #tpu.dot_dimension_numbers<[1], [0], [0], [1], [0, 0, 1, 1], [], []>} : vector<16x8xf32>, vector<8x128xf32>, vector<16x128xf32> -> vector<16x128xf32>
    %c0_3 = arith.constant 0 : index
    %c0_4 = arith.constant 0 : index
    %3 = vector.load %arg3[%c0_3, %c0_4] : memref<16x1xf32, #tpu.memory_space<vmem>>, vector<16x1xf32>
    %4 = vector.broadcast %3 : vector<16x1xf32> to vector<16x128xf32>
    %5 = arith.addf %2, %4 : vector<16x128xf32>
    %cst_5 = arith.constant 0.000000e+00 : f32
    %6 = vector.broadcast %cst_5 : f32 to vector<16x128xf32>
    %7 = arith.maximumf %5, %6 : vector<16x128xf32>
    %c0_6 = arith.constant 0 : index
    %c0_7 = arith.constant 0 : index
    %8 = vector.load %arg4[%c0_6, %c0_7] : memref<32x16xf32, #tpu.memory_space<vmem>>, vector<32x16xf32>
    %cst_8 = arith.constant dense<0.000000e+00> : vector<32x128xf32>
    %9 = tpu.matmul %8, %7, %cst_8 {dimension_numbers = #tpu.dot_dimension_numbers<[1], [0], [0], [1], [0, 0, 1, 1], [], []>} : vector<32x16xf32>, vector<16x128xf32>, vector<32x128xf32> -> vector<32x128xf32>
    %c0_9 = arith.constant 0 : index
    %c0_10 = arith.constant 0 : index
    %10 = vector.load %arg5[%c0_9, %c0_10] : memref<32x1xf32, #tpu.memory_space<vmem>>, vector<32x1xf32>
    %11 = vector.broadcast %10 : vector<32x1xf32> to vector<32x128xf32>
    %12 = arith.addf %9, %11 : vector<32x128xf32>
    %cst_11 = arith.constant 0.000000e+00 : f32
    %13 = vector.broadcast %cst_11 : f32 to vector<32x128xf32>
    %14 = arith.maximumf %12, %13 : vector<32x128xf32>
    %c0_12 = arith.constant 0 : index
    %c0_13 = arith.constant 0 : index
    %15 = vector.load %arg6[%c0_12, %c0_13] : memref<32x1xf32, #tpu.memory_space<vmem>>, vector<32x1xf32>
    %16 = vector.broadcast %15 : vector<32x1xf32> to vector<32x128xf32>
    %17 = arith.mulf %14, %16 : vector<32x128xf32>
    %cst_14 = arith.constant dense<0.000000e+00> : vector<128xf32>
    %18 = vector.multi_reduction <add>, %17, %cst_14 [0] : vector<32x128xf32> to vector<128xf32>
    %19 = vector.shape_cast %18 : vector<128xf32> to vector<1x128xf32>
    %c0_15 = arith.constant 0 : index
    %c0_16 = arith.constant 0 : index
    %20 = memref.load %arg7[%c0_15, %c0_16] : memref<1x1xf32, #tpu.memory_space<smem>>
    %21 = vector.broadcast %20 : f32 to vector<1x128xf32>
    %22 = arith.addf %19, %21 : vector<1x128xf32>
    %c0_17 = arith.constant 0 : index
    %c0_18 = arith.constant 0 : index
    %23 = vector.load %arg8[%c0_17, %c0_18] : memref<1x128xf32, #tpu.memory_space<vmem>>, vector<1x128xf32>
    tpu.vector_store %arg8[%c0_17, %c0_18], %22 {strides = array<i32>} : memref<1x128xf32, #tpu.memory_space<vmem>>, vector<1x128xf32>,
    return
  }
  func.func @transform_0(%arg0: i32) -> (i32, i32) {
    %c0_i32 = arith.constant 0 : i32
    %c0_i32_0 = arith.constant 0 : i32
    return %c0_i32, %arg0 : i32, i32
  }
  func.func @transform_1(%arg0: i32) -> (i32, i32) {
    %c0_i32 = arith.constant 0 : i32
    %c0_i32_0 = arith.constant 0 : i32
    %c0_i32_1 = arith.constant 0 : i32
    return %c0_i32, %c0_i32_0 : i32, i32
  }
  func.func @transform_2(%arg0: i32) -> (i32, i32) {
    %c0_i32 = arith.constant 0 : i32
    %c0_i32_0 = arith.constant 0 : i32
    %c0_i32_1 = arith.constant 0 : i32
    return %c0_i32, %c0_i32_0 : i32, i32
  }
  func.func @transform_3(%arg0: i32) -> (i32, i32) {
    %c0_i32 = arith.constant 0 : i32
    %c0_i32_0 = arith.constant 0 : i32
    %c0_i32_1 = arith.constant 0 : i32
    return %c0_i32, %c0_i32_0 : i32, i32
  }
  func.func @transform_4(%arg0: i32) -> (i32, i32) {
    %c0_i32 = arith.constant 0 : i32
    %c0_i32_0 = arith.constant 0 : i32
    %c0_i32_1 = arith.constant 0 : i32
    return %c0_i32, %c0_i32_0 : i32, i32
  }
  func.func @transform_5(%arg0: i32) -> (i32, i32) {
    %c0_i32 = arith.constant 0 : i32
    %c0_i32_0 = arith.constant 0 : i32
    %c0_i32_1 = arith.constant 0 : i32
    return %c0_i32, %c0_i32_0 : i32, i32
  }
  func.func @transform_6(%arg0: i32) -> (i32, i32) {
    %c0_i32 = arith.constant 0 : i32
    %c0_i32_0 = arith.constant 0 : i32
    %c0_i32_1 = arith.constant 0 : i32
    return %c0_i32, %c0_i32_0 : i32, i32
  }
  func.func @transform_7(%arg0: i32) -> (i32, i32) {
    %c0_i32 = arith.constant 0 : i32
    %c0_i32_0 = arith.constant 0 : i32
    return %c0_i32, %arg0 : i32, i32
  }
}

</mosaic_0001>

<bundles_post_ra>
// kernel: tpu_custom_call.1
= control target key start
LH: loop header
LB: loop body
LE: loop exit
PB: predicated region body
PF: predicated region fallthrough
CT: control target
= control target key end

     0   :  { %vm43_vm0 = vcmask 64512   ;;  %v247_v3 = vmov 0   ;;  %s346_s0 = inlined_call_operand.vmem [shape: f32[8,128], index: 0, kind: input, shape index: {}]   ;;  %s347_s1 = inlined_call_operand.vmem [shape: f32[16,8], index: 1, kind: input, shape index: {}]   ;;  %s348_s2 = inlined_call_operand.vmem [shape: f32[16,1], index: 2, kind: input, shape index: {}]   ;;  %s349_s3 = inlined_call_operand.vmem [shape: f32[32,16], index: 3, kind: input, shape index: {}]   ;;  %s350_s4 = inlined_call_operand.vmem [shape: f32[32,1], index: 4, kind: input, shape index: {}]   ;;  %s351_s5 = inlined_call_operand.vmem [shape: f32[32,1], index: 5, kind: input, shape index: {}]   ;;  %s352_s6 = inlined_call_operand.<no memory space> [shape: f32[1,1], index: 6, kind: input, shape index: {}]   ;;  %s353_s7 = inlined_call_operand.hbm [shape: f32[1,128], index: 7, kind: output, shape index: {}]  }
   0x1   :  { %v30_v0 = vld [vmem:[%s346_s0] sm:$0xff]  ;;  %v32_v1 = vld [vmem:[%s348_s2 + $0x8] sm:$0xff]  ;;  %218 = vset.pattern.permute.xlu0 %v247_v3 }
   0x2   :  { %v28_v2 = vld [vmem:[%s347_s1] sm:$0xff]  ;;  %65 = vmatpush.msra.mxu0 %v30_v0  ;;  %40 = vperm.xlu0 %218, %v32_v1  }
   0x3   :  { %206 = vmatmul.msk.f32.vlgmr.msra.gmra.mxu0 %vm43_vm0, %v28_v2 }
   0x4   :  { %13 = vsyncpa [#allocation4], 0  ;;  %219 = vset.pattern.permute.xlu1 %v247_v3  ;;  %220 = vset.pattern.permute.xlu2 %v247_v3  ;;  %v31_v4 = vld [vmem:[%s348_s2] sm:$0xff]  ;;  %v29_v5 = vld [vmem:[%s347_s1 + $0x8] sm:$0xff]  ;;  %vm103_vm1 = vcmask 130048   ;;  %v187_v58 = vstv %s352_s6  ;;  %s248_s8 = smov [#allocation3]  }
   0x5   :  { %v149_v6 = vld [vmem:[%s351_s5] sm:$0xff]  ;;  %v152_v7 = vld [vmem:[%s351_s5 + $0x18] sm:$0xff]  ;;  %v80_v9 = vld [vmem:[%s350_s4 + $0x8] sm:$0xff]  ;;  %s195_s0 = sshll.u32 %s248_s8, 4  ;;  %s197_s11 = sshll.u32 %s353_s7, 4  ;;  %s196_s0 = int_to_ptr.vmem [resolvable:$true] %s195_s0  ;;  %s198_s11 = int_to_ptr.hbm [resolvable:$true] %s197_s11 }
   0x6   :  { %v79_v8 = vld [vmem:[%s350_s4] sm:$0xff]  ;;  %v150_v10 = vld [vmem:[%s351_s5 + $0x8] sm:$0xff]  ;;  %v81_v11 = vld [vmem:[%s350_s4 + $0x10] sm:$0xff] }
   0x7   :  { %85 = vperm.xlu1 %219, %v79_v8   ;;  %95 = vperm.xlu2 %220, %v81_v11   ;;  %v82_v13 = vld [vmem:[%s350_s4 + $0x18] sm:$0xff]  ;;  %v151_v15 = vld [vmem:[%s351_s5 + $0x10] sm:$0xff]  ;;  %v75_v22 = vld [vmem:[%s349_s3] sm:$0xff] }
   0x8   :  { %v76_v23 = vld [vmem:[%s349_s3 + $0x8] sm:$0xff]  ;;  %v78_v24 = vld [vmem:[%s349_s3 + $0x18] sm:$0xff]  ;;  %v77_v25 = vld [vmem:[%s349_s3 + $0x10] sm:$0xff] }
   0xa   :  { %35 = vperm.xlu0 %218, %v31_v4  }
   0xb   :  { %207 = vmatmul.msk.f32.gmra.mxu0 %vm43_vm0, %v29_v5 }
   0xf   :  { %90 = vperm.xlu1 %219, %v80_v9   ;;  %100 = vperm.xlu2 %220, %v82_v13  }
  0x12   :  { %155 = vperm.xlu0 %218, %v149_v6  }
  0x17   :  { %160 = vperm.xlu1 %219, %v150_v10   ;;  %165 = vperm.xlu2 %220, %v151_v15  }
  0x1a   :  { %170 = vperm.xlu0 %218, %v152_v7  }
  0x61   :  { %v96_v27 = vpop.permute.xlu2 %95 }
  0x69   :  { %v101_v32 = vpop.permute.xlu2 %100 }
  0x71   :  { %v166_v46 = vpop.permute.xlu2 %165 }
  0x74   :  { %v41_v12 = vpop.permute.xlu0 %40 }
  0x79   :  { %v86_v26 = vpop.permute.xlu1 %85 }
  0x7c   :  { %v36_v16 = vpop.permute.xlu0 %35 }
  0x80   :  { %v67_v14 = vpop.f32.mrf.mxu0 }
  0x81   :  { %v68_v18 = vadd.f32 %v67_v14, %v36_v16  ;;  %v91_v28 = vpop.permute.xlu1 %90 }
  0x83   :  { %v73_v21 = vmax.f32 %v68_v18, 0.0 }
  0x84   :  { %v156_v34 = vpop.permute.xlu0 %155 }
  0x88   :  { %v70_v17 = vpop.f32.mrf.mxu0 }
  0x89   :  { %v71_v19 = vadd.f32 %v70_v17, %v41_v12  ;;  %v161_v39 = vpop.permute.xlu1 %160 }
  0x8b   :  { %v74_v20 = vmax.f32 %v71_v19, 0.0 }
  0x8c   :  { %v171_v49 = vpop.permute.xlu0 %170 }
  0x8d   :  { %130 = vmatpush.msra.mxu1 %v74_v20  ;;  %212 = vmatpush.msra.mxu2 %v74_v20 }
  0x8e   :  { %213 = vmatpush.msra.mxu3 %v74_v20 }
  0x8f   :  { %131 = vmatpush.msra.mxu1 %v73_v21  ;;  %214 = vmatpush.msra.mxu2 %v73_v21 }
  0x90   :  { %215 = vmatpush.msra.mxu3 %v73_v21  ;;  %208 = vmatmul.msk.f32.vlgmr.msra.gmra.mxu1 %vm103_vm1, %v75_v22 }
  0x91   :  { %209 = vmatmul.msk.f32.vlgmr.msra.gmra.mxu2 %vm103_vm1, %v76_v23  ;;  %211 = vmatmul.msk.f32.vlgmr.msra.gmra.mxu3 %vm103_vm1, %v78_v24 }
  0x99   :  { %210 = vmatmul.msk.f32.gmra.mxu2 %vm103_vm1, %v77_v25 }
 0x10d   :  { %v133_v29 = vpop.f32.mrf.mxu1 }
 0x10e   :  { %v134_v33 = vadd.f32 %v133_v29, %v86_v26 }
 0x110   :  { %v145_v37 = vmax.f32 %v134_v33, 0.0 }
 0x112   :  { %v173_v43 = vmul.f32 %v156_v34, %v145_v37 }
 0x114   :  { %v136_v30 = vpop.f32.mrf.mxu2  ;;  %v142_v35 = vpop.f32.mrf.mxu3 }
 0x115   :  { %v137_v31 = vadd.f32 %v136_v30, %v91_v28  ;;  %v143_v38 = vadd.f32 %v142_v35, %v101_v32 }
 0x117   :  { %v146_v36 = vmax.f32 %v137_v31, 0.0  ;;  %v148_v44 = vmax.f32 %v143_v38, 0.0 }
 0x119   :  { %v174_v41 = vmul.f32 %v161_v39, %v146_v36  ;;  %v176_v50 = vmul.f32 %v171_v49, %v148_v44 }
 0x11b   :  { %v177_v47 = vadd.f32 %v174_v41, %v173_v43 }
 0x11c   :  { %v139_v40 = vpop.f32.mrf.mxu2 }
 0x11d   :  { %v140_v42 = vadd.f32 %v139_v40, %v96_v27 }
 0x11f   :  { %v147_v45 = vmax.f32 %v140_v42, 0.0 }
 0x121   :  { %v175_v48 = vmul.f32 %v166_v46, %v147_v45 }
 0x123   :  { %v178_v51 = vadd.f32 %v177_v47, %v175_v48 }
 0x125   :  { %v179_v52 = vadd.f32 %v178_v51, %v176_v50 }
 0x127   :  { %v180_v53 = vrot.slane %v179_v52, 4 }
 0x129   :  { %v181_v54 = vadd.f32 %v180_v53, %v179_v52 }
 0x12b   :  { %v182_v55 = vrot.slane %v181_v54, 2 }
 0x12d   :  { %v183_v56 = vadd.f32 %v182_v55, %v181_v54 }
 0x12f   :  { %v184_v57 = vrot.slane %v183_v56, 1 }
 0x131   :  { %v185_v59 = vadd.f32 %v184_v57, %v183_v56 }
 0x133   :  { %v188_v60 = vadd.f32 %v187_v58, %v185_v59 }
 0x135   :  { %189 = vst [vmem:[#allocation3] sm:$0x1] %v188_v60 }
 0x136   :  { %200 = dma.vmem_to_hbm [thread:$0]  %s196_s0, 16, %s198_s11, [#allocation4]  }
 0x137   :  { %245 = dma.done.wait [#allocation4], 16  }
 0x138   :  { %246 = vsyncadd [#allocation4], 4294967280 }
 0x139   :  { %205 = vsyncpa [#allocation4], 1 }

</bundles_post_ra>
